<compile_context>
chip_gen: v7x
topology: tpu7x:2x2x1
jax: 0.10.0
libtpu: 0.0.40
codegen_flags: <defaults>
</compile_context>

<pallas_src>
import functools

import jax
import jax.numpy as jnp
from jax.experimental import pallas as pl
from jax.experimental.pallas import tpu as pltpu


def _h_sigmoid_kernel(x_ref, o_ref, *, scale):
    x = x_ref[...]
    if not jnp.issubdtype(x.dtype, jnp.floating):
        x = x.astype(jnp.float32)
    # relu6(x + 3) * h_max / 6  ==  clip(x + 3, 0, 6) * scale
    y = jnp.clip(x + 3.0, 0.0, 6.0) * scale
    o_ref[...] = y.astype(o_ref.dtype)


def h_sigmoid(x, h_max: float = 1.0, *, block_rows: int = 512, lanes: int = 1024):
    """Elementwise hard-sigmoid. Works for any shape (NCHW expected)."""
    orig_shape = x.shape
    orig_dtype = x.dtype
    total = x.size
    scale = float(h_max) / 6.0

    # Lane-dense flattening: 1D -> (rows, lanes) with lanes a multiple of 128.
    if total < lanes:
        lanes = 128
    flat = x.reshape(-1)
    pad = (-total) % lanes
    if pad:
        flat = jnp.pad(flat, (0, pad))
    rows = (total + pad) // lanes
    x2d = flat.reshape(rows, lanes)

    # Block sizing: aim for ~2 MiB f32 blocks; shrink to full extent if small.
    br = min(block_rows, rows)
    if br < rows:
        br = max(8, (br // 8) * 8)  # keep sublane-aligned when tiling rows
    grid = (pl.cdiv(rows, br),)

    out2d = pl.pallas_call(
        functools.partial(_h_sigmoid_kernel, scale=scale),
        out_shape=jax.ShapeDtypeStruct((rows, lanes), orig_dtype),
        grid=grid,
        in_specs=[pl.BlockSpec((br, lanes), lambda i: (i, 0))],
        out_specs=pl.BlockSpec((br, lanes), lambda i: (i, 0)),
        compiler_params=pltpu.CompilerParams(
            dimension_semantics=("parallel",)),
    )(x2d)

    out_flat = out2d.reshape(-1)
    if pad:
        out_flat = out_flat[:total]
    return out_flat.reshape(orig_shape)


def h_sigmoid_ref(x, h_max: float = 1.0):
    xf = x.astype(jnp.float32)
    return (jnp.clip(xf + 3.0, 0.0, 6.0) * h_max / 6.0).astype(x.dtype)


if __name__ == "__main__":
    key = jax.random.PRNGKey(0)
    # Small NCHW input consistent with how h_sigmoid is used inside DynamicHead.
    x = jax.random.normal(key, (2, 4, 16, 16), dtype=jnp.float32) * 4.0

    out = h_sigmoid(x, h_max=1.0)
    out = jax.block_until_ready(out)

    ref = h_sigmoid_ref(x, h_max=1.0)
    assert out.shape == x.shape and out.dtype == x.dtype
    assert jnp.max(jnp.abs(out - ref)) < 1e-6

    print("KERNEL_OK")
</pallas_src>

<mosaic_0001>
module attributes {stable_mosaic.version = 11 : i64} {
  func.func @_h_sigmoid_kernel(%arg0: i32, %arg1: memref<2x1024xf32, #tpu.memory_space<vmem>>, %arg2: memref<2x1024xf32, #tpu.memory_space<vmem>>) attributes {dimension_semantics = [#tpu.dimension_semantics<parallel>], iteration_bounds = array<i64: 1>, scalar_prefetch = 0 : i64, scratch_operands = 0 : i64, tpu.core_type = #tpu.core_type<tc>, window_params = [{transform_indices = @transform_0, window_bounds = array<i64: 2, 1024>}, {transform_indices = @transform_1, window_bounds = array<i64: 2, 1024>}]} {
    %c0 = arith.constant 0 : index
    %c0_0 = arith.constant 0 : index
    %0 = vector.load %arg1[%c0, %c0_0] : memref<2x1024xf32, #tpu.memory_space<vmem>>, vector<2x1024xf32>
    %cst = arith.constant 3.000000e+00 : f32
    %1 = vector.broadcast %cst : f32 to vector<2x1024xf32>
    %2 = arith.addf %0, %1 : vector<2x1024xf32>
    %cst_1 = arith.constant 0.000000e+00 : f32
    %cst_2 = arith.constant 6.000000e+00 : f32
    %3 = vector.broadcast %cst_1 : f32 to vector<2x1024xf32>
    %4 = arith.maximumf %3, %2 : vector<2x1024xf32>
    %5 = vector.broadcast %cst_2 : f32 to vector<2x1024xf32>
    %6 = arith.minimumf %5, %4 : vector<2x1024xf32>
    %cst_3 = arith.constant 0.166666672 : f32
    %7 = vector.broadcast %cst_3 : f32 to vector<2x1024xf32>
    %8 = arith.mulf %6, %7 : vector<2x1024xf32>
    %c0_4 = arith.constant 0 : index
    %c0_5 = arith.constant 0 : index
    %9 = vector.load %arg2[%c0_4, %c0_5] : memref<2x1024xf32, #tpu.memory_space<vmem>>, vector<2x1024xf32>
    tpu.vector_store %arg2[%c0_4, %c0_5], %8 {strides = array<i32>} : memref<2x1024xf32, #tpu.memory_space<vmem>>, vector<2x1024xf32>,
    return
  }
  func.func @transform_0(%arg0: i32) -> (i32, i32) {
    %c0_i32 = arith.constant 0 : i32
    %c0_i32_0 = arith.constant 0 : i32
    return %arg0, %c0_i32 : i32, i32
  }
  func.func @transform_1(%arg0: i32) -> (i32, i32) {
    %c0_i32 = arith.constant 0 : i32
    %c0_i32_0 = arith.constant 0 : i32
    return %arg0, %c0_i32 : i32, i32
  }
}

</mosaic_0001>

<bundles_post_ra>
// kernel: tpu_custom_call.1
= control target key start
LH: loop header
LB: loop body
LE: loop exit
PB: predicated region body
PF: predicated region fallthrough
CT: control target
= control target key end

     0   :  { %6 = vsyncpa [#allocation3], 0  ;;  %s134_s0 = inlined_call_operand.hbm [shape: f32[2,1024], index: 0, kind: input, shape index: {}]   ;;  %s135_s1 = inlined_call_operand.hbm [shape: f32[2,1024], index: 1, kind: output, shape index: {}]  }
   0x1   :  { %7 = vsyncpa [#allocation4], 0  ;;  %s98_s6 = smov [#allocation2]   ;;  %s50_s10 = scalar_lea.hbm %s134_s0, 256 }
   0x2   :  { %s14_s7 = sshll.u32 %s98_s6, 4  ;;  %p51_p0 = scmp.ne.s32.totalorder %s134_s0, %s50_s10  ;;  %s15_s7 = int_to_ptr.vmem [resolvable:$true] %s14_s7 }
   0x3   :  { %p54_p1 = scmp.lt.u32.totalorder %s50_s10, %s134_s0 }
   0x5   :  { %p56_p2 = pnand %p54_p1, %p51_p0 }
   0x7   :  { %59 = shalt.err (!%p56_p2)
}
   0x8   :  { %s60_s15 = scalar_lea.vmem %s15_s7, 256  ;;  %p65_p4 = scmp.lt.s32.totalorder %s15_s7, %s15_s7 }
   0x9   :  { %p61_p3 = scmp.ne.s32.totalorder %s15_s7, %s60_s15  ;;  %p66_p5 = scmp.lt.s32.totalorder %s60_s15, %s60_s15 }
   0xb   :  { %p67_p6 = por %p66_p5, %p65_p4 }
   0xd   :  { %p68_p7 = pnand %p67_p6, %p61_p3 }
   0xf   :  { %71 = shalt.err (!%p68_p7)
}
  0x10   :  { %17 = dma.hbm_to_vmem [thread:$0]  %s134_s0, 256, %s15_s7, [#allocation3]  }
  0x11   :  { %94 = dma.done.wait [#allocation3], 256  }
  0x12   :  { %95 = vsyncadd [#allocation3], 4294967040  ;;  %v21_v0 = vld [vmem:[#allocation2] sm:$0xff]  ;;  %v22_v1 = vld [vmem:[#allocation2 + $0x8] sm:$0xff]  ;;  %s99_s18 = smov [#allocation5]  }
  0x13   :  { %v23_v2 = vadd.f32 3.0, %v21_v0  ;;  %v24_v3 = vadd.f32 3.0, %v22_v1  ;;  %s39_s19 = sshll.u32 %s99_s18, 4  ;;  %s40_s19 = int_to_ptr.vmem [resolvable:$true] %s39_s19 }
  0x14   :  { %s72_s20 = scalar_lea.vmem %s40_s19, 256  ;;  %p77_p9 = scmp.lt.s32.totalorder %s40_s19, %s40_s19 }
  0x15   :  { %v25_v4 = vmax.f32 %v23_v2, 0.0  ;;  %v26_v5 = vmax.f32 %v24_v3, 0.0  ;;  %p73_p8 = scmp.ne.s32.totalorder %s40_s19, %s72_s20  ;;  %p78_p10 = scmp.lt.s32.totalorder %s72_s20, %s72_s20 }
  0x17   :  { %v27_v6 = vmin.f32 %v25_v4, 6.0  ;;  %v28_v7 = vmin.f32 %v26_v5, 6.0  ;;  %p79_p11 = por %p78_p10, %p77_p9 }
  0x19   :  { %v29_v8 = vmul.f32 0.16666667, %v27_v6  ;;  %v30_v9 = vmul.f32 0.16666667, %v28_v7  ;;  %p80_p12 = pnand %p79_p11, %p73_p8 }
  0x1b   :  { %31 = vst [vmem:[#allocation5] sm:$0xff] %v29_v8  ;;  %32 = vst [vmem:[#allocation5 + $0x8] sm:$0xff] %v30_v9 }
  0x1c   :  { %83 = shalt.err (!%p80_p12)
}
  0x1d   :  { %s84_s22 = scalar_lea.hbm %s135_s1, 256 }
  0x1e   :  { %p85_p13 = scmp.ne.s32.totalorder %s135_s1, %s84_s22  ;;  %p88_p0 = scmp.lt.u32.totalorder %s84_s22, %s135_s1 }
  0x20   :  { %p90_p1 = pnand %p88_p0, %p85_p13 }
  0x22   :  { %93 = shalt.err (!%p90_p1)
}
  0x23   :  { %42 = dma.vmem_to_hbm [thread:$0]  %s40_s19, 256, %s135_s1, [#allocation4]  }
  0x24   :  { %96 = dma.done.wait [#allocation4], 256  }
  0x25   :  { %97 = vsyncadd [#allocation4], 4294967040 }
  0x26   :  { %46 = vsyncpa [#allocation3], 1 }
  0x27   :  { %47 = vsyncpa [#allocation4], 1 }

</bundles_post_ra>
